<compile_context>
chip_gen: v7x
topology: tpu7x:2x2x1
jax: 0.10.0
libtpu: 0.0.40
codegen_flags: <defaults>
</compile_context>

<pallas_src>
import functools

import jax
import jax.numpy as jnp
from jax.experimental import pallas as pl
from jax.experimental.pallas import tpu as pltpu


def _round_up(a, b):
    return (a + b - 1) // b * b


def _conv_stats_kernel(p_ref, w_ref, conv_ref, sum_ref, sumsq_ref):
    # p_ref:    (Kp, TILE_M) bf16 im2col patches (transposed, lane = pixels)
    # w_ref:    (Cout, Kp)   bf16 reshaped conv weight
    # conv_ref: (Cout, TILE_M) f32 conv output tile
    # sum_ref / sumsq_ref: (Cout, 1) f32 resident accumulators (same block
    #                      across the whole grid -> P3 accumulate pattern)
    i = pl.program_id(0)

    @pl.when(i == 0)
    def _init():
        sum_ref[...] = jnp.zeros_like(sum_ref)
        sumsq_ref[...] = jnp.zeros_like(sumsq_ref)

    acc = jnp.dot(w_ref[...], p_ref[...], preferred_element_type=jnp.float32)
    conv_ref[...] = acc.astype(conv_ref.dtype)
    # Single-sweep stats: sum and sum-of-squares (var finished outside).
    sum_ref[...] += jnp.sum(acc, axis=1, keepdims=True)
    sumsq_ref[...] += jnp.sum(acc * acc, axis=1, keepdims=True)


def _bn_mish_kernel(conv_ref, scale_ref, shift_ref, o_ref):
    # conv_ref: (Cout, TILE_M) f32 ; scale/shift: (Cout, 1) f32
    y = conv_ref[...] * scale_ref[...] + shift_ref[...]

    # Mish with a single transcendental + approx reciprocal.
    t = jnp.exp(-jnp.abs(y))
    pos = y >= 0.0
    num = jnp.where(pos, 1.0 + 2.0 * t, t * (t + 2.0))
    den = jnp.where(pos, 1.0 + 2.0 * t + 2.0 * t * t, t * (t + 2.0) + 2.0)
    o_ref[...] = (y * num * pl.reciprocal(den, approx=True)).astype(o_ref.dtype)


def simple_conv_forward(x_nchw, weight, gamma, beta, *, stride=1, padding=0,
                        dilation=1, eps=1e-5, tile_m=256):
    """SimpleConv.forward. x_nchw: (N, Cin, H, W); weight: (Cout, Cin, KH, KW)."""
    N, Cin, H, W = x_nchw.shape
    Cout, _, KH, KW = weight.shape
    s, d, p = stride, dilation, padding

    Ho = (H + 2 * p - d * (KH - 1) - 1) // s + 1
    Wo = (W + 2 * p - d * (KW - 1) - 1) // s + 1
    M = N * Ho * Wo
    K = KH * KW * Cin

    tile_m = max(128, _round_up(tile_m, 128))   # lane-aligned M tiles
    Mp = _round_up(M, tile_m)                   # zero-padded pixels: conv=0 ->
    Kp = _round_up(K, 16)                       #   contribute 0 to sum/sumsq
    n_tiles = Mp // tile_m

    # ---- plain-JAX glue: transposed im2col (K, M), lane-dense over pixels ----
    xp = jnp.pad(x_nchw, ((0, 0), (0, 0), (p, p), (p, p)))
    cols = [xp[:, :, kh * d:kh * d + (Ho - 1) * s + 1:s,
                   kw * d:kw * d + (Wo - 1) * s + 1:s]      # (N, Cin, Ho, Wo)
            for kh in range(KH) for kw in range(KW)]
    patches = jnp.stack(cols, axis=0)                        # (KH*KW, N, Cin, Ho, Wo)
    patches = jnp.transpose(patches, (0, 2, 1, 3, 4)).reshape(K, M)
    patches = jnp.pad(patches, ((0, Kp - K), (0, Mp - M))).astype(jnp.bfloat16)

    w2d = jnp.transpose(weight, (0, 2, 3, 1)).reshape(Cout, K)   # (Cout, kh*kw*ci)
    w2d = jnp.pad(w2d, ((0, 0), (0, Kp - K))).astype(jnp.bfloat16)

    # ---- pass 1: conv matmul + per-channel sum / sum-of-squares ----
    conv, csum, csq = pl.pallas_call(
        _conv_stats_kernel,
        grid=(n_tiles,),
        in_specs=[pl.BlockSpec((Kp, tile_m), lambda i: (0, i)),
                  pl.BlockSpec((Cout, Kp), lambda i: (0, 0))],
        out_specs=(pl.BlockSpec((Cout, tile_m), lambda i: (0, i)),
                   pl.BlockSpec((Cout, 1), lambda i: (0, 0)),
                   pl.BlockSpec((Cout, 1), lambda i: (0, 0))),
        out_shape=(jax.ShapeDtypeStruct((Cout, Mp), jnp.float32),
                   jax.ShapeDtypeStruct((Cout, 1), jnp.float32),
                   jax.ShapeDtypeStruct((Cout, 1), jnp.float32)),
        compiler_params=pltpu.CompilerParams(
            dimension_semantics=("arbitrary",)),
    )(patches, w2d)

    # ---- tiny inter-pass scalar math (BatchNorm training-mode batch stats) ----
    inv_m = 1.0 / float(M)                      # true M, not padded Mp
    mean = csum * inv_m
    var = jnp.maximum(csq * inv_m - mean * mean, 0.0)   # biased variance
    scale = gamma.reshape(Cout, 1).astype(jnp.float32) * jax.lax.rsqrt(var + eps)
    shift = beta.reshape(Cout, 1).astype(jnp.float32) - mean * scale

    # ---- pass 2: BN affine + Mish, embarrassingly parallel over M ----
    out2d = pl.pallas_call(
        _bn_mish_kernel,
        grid=(n_tiles,),
        in_specs=[pl.BlockSpec((Cout, tile_m), lambda i: (0, i)),
                  pl.BlockSpec((Cout, 1), lambda i: (0, 0)),
                  pl.BlockSpec((Cout, 1), lambda i: (0, 0))],
        out_specs=pl.BlockSpec((Cout, tile_m), lambda i: (0, i)),
        out_shape=jax.ShapeDtypeStruct((Cout, Mp), jnp.float32),
        compiler_params=pltpu.CompilerParams(
            dimension_semantics=("parallel",)),
    )(conv, scale, shift)

    # (Cout, M) -> NCHW. The permute only swaps small leading axes over
    # contiguous HoWo planes (much cheaper than a channel-last transpose).
    out = out2d[:, :M].reshape(Cout, N, Ho, Wo)
    return jnp.transpose(out, (1, 0, 2, 3))


def _reference(x, weight, gamma, beta, stride, padding, dilation, eps):
    """Pure-JAX reference of Conv2d + BatchNorm2d(train) + Mish."""
    y = jax.lax.conv_general_dilated(
        x, weight, window_strides=(stride, stride),
        padding=((padding, padding), (padding, padding)),
        rhs_dilation=(dilation, dilation),
        dimension_numbers=('NCHW', 'OIHW', 'NCHW'))
    mean = jnp.mean(y, axis=(0, 2, 3), keepdims=True)
    var = jnp.mean(jnp.square(y - mean), axis=(0, 2, 3), keepdims=True)
    yb = (y - mean) * jax.lax.rsqrt(var + eps) * gamma.reshape(1, -1, 1, 1) \
        + beta.reshape(1, -1, 1, 1)
    return yb * jnp.tanh(jax.nn.softplus(yb))


if __name__ == "__main__":
    # Small deterministic problem: N=2, Cin=4, H=W=16, Cout=8, 3x3, pad=1
    key = jax.random.PRNGKey(0)
    k_x, k_w, k_g, k_b = jax.random.split(key, 4)

    N, Cin, H, W = 2, 4, 16, 16
    Cout, KH, KW = 8, 3, 3
    padding = 1

    x = jax.random.normal(k_x, (N, Cin, H, W), dtype=jnp.float32)
    weight = 0.1 * jax.random.normal(k_w, (Cout, Cin, KH, KW), dtype=jnp.float32)
    gamma = 1.0 + 0.1 * jax.random.normal(k_g, (Cout,), dtype=jnp.float32)
    beta = 0.1 * jax.random.normal(k_b, (Cout,), dtype=jnp.float32)

    fwd = jax.jit(functools.partial(simple_conv_forward, stride=1,
                                    padding=padding, tile_m=256))
    out = jax.block_until_ready(fwd(x, weight, gamma, beta))

    ref = _reference(x, weight, gamma, beta, 1, padding, 1, 1e-5)
    assert out.shape == (N, Cout, H, W), out.shape
    max_err = float(jnp.max(jnp.abs(out - ref)))
    # bf16 matmul inputs + approx reciprocal -> loosened tolerance.
    assert jnp.allclose(out, ref, atol=3e-2, rtol=3e-2), max_err

    print("KERNEL_OK")
</pallas_src>

<mosaic_0001>
module attributes {stable_mosaic.version = 11 : i64} {
  func.func @_conv_stats_kernel(%arg0: i32, %arg1: memref<48x256xbf16, #tpu.memory_space<vmem>>, %arg2: memref<8x48xbf16, #tpu.memory_space<vmem>>, %arg3: memref<8x256xf32, #tpu.memory_space<vmem>>, %arg4: memref<8x1xf32, #tpu.memory_space<vmem>>, %arg5: memref<8x1xf32, #tpu.memory_space<vmem>>) attributes {dimension_semantics = [#tpu.dimension_semantics<arbitrary>], iteration_bounds = array<i64: 2>, scalar_prefetch = 0 : i64, scratch_operands = 0 : i64, tpu.core_type = #tpu.core_type<tc>, window_params = [{transform_indices = @transform_0, window_bounds = array<i64: 48, 256>}, {pipeline_mode = #tpu.pipeline_mode<synchronous>, transform_indices = @transform_1, window_bounds = array<i64: 8, 48>}, {transform_indices = @transform_2, window_bounds = array<i64: 8, 256>}, {pipeline_mode = #tpu.pipeline_mode<synchronous>, transform_indices = @transform_3, window_bounds = array<i64: 8, 1>}, {pipeline_mode = #tpu.pipeline_mode<synchronous>, transform_indices = @transform_4, window_bounds = array<i64: 8, 1>}]} {
    %c0_i32 = arith.constant 0 : i32
    %0 = arith.cmpi eq, %arg0, %c0_i32 : i32
    %1 = arith.extui %0 : i1 to i32
    %c0_i32_0 = arith.constant 0 : i32
    %2 = arith.cmpi ne, %1, %c0_i32_0 : i32
    scf.if %2 {
      %cst_16 = arith.constant 0.000000e+00 : f32
      %18 = vector.broadcast %cst_16 : f32 to vector<8x1xf32>
      %c0_17 = arith.constant 0 : index
      %c0_18 = arith.constant 0 : index
      %19 = vector.load %arg4[%c0_17, %c0_18] : memref<8x1xf32, #tpu.memory_space<vmem>>, vector<8x1xf32>
      tpu.vector_store %arg4[%c0_17, %c0_18], %18 {strides = array<i32>} : memref<8x1xf32, #tpu.memory_space<vmem>>, vector<8x1xf32>,
      %cst_19 = arith.constant 0.000000e+00 : f32
      %20 = vector.broadcast %cst_19 : f32 to vector<8x1xf32>
      %c0_20 = arith.constant 0 : index
      %c0_21 = arith.constant 0 : index
      %21 = vector.load %arg5[%c0_20, %c0_21] : memref<8x1xf32, #tpu.memory_space<vmem>>, vector<8x1xf32>
      tpu.vector_store %arg5[%c0_20, %c0_21], %20 {strides = array<i32>} : memref<8x1xf32, #tpu.memory_space<vmem>>, vector<8x1xf32>,
    } else {
    }
    %c0 = arith.constant 0 : index
    %c0_1 = arith.constant 0 : index
    %3 = vector.load %arg2[%c0, %c0_1] : memref<8x48xbf16, #tpu.memory_space<vmem>>, vector<8x48xbf16>
    %c0_2 = arith.constant 0 : index
    %c0_3 = arith.constant 0 : index
    %4 = vector.load %arg1[%c0_2, %c0_3] : memref<48x256xbf16, #tpu.memory_space<vmem>>, vector<48x256xbf16>
    %cst = arith.constant dense<0.000000e+00> : vector<8x256xf32>
    %5 = tpu.matmul %3, %4, %cst {dimension_numbers = #tpu.dot_dimension_numbers<[1], [0], [0], [1], [0, 0, 1, 1], [], []>} : vector<8x48xbf16>, vector<48x256xbf16>, vector<8x256xf32> -> vector<8x256xf32>
    %c0_4 = arith.constant 0 : index
    %c0_5 = arith.constant 0 : index
    %6 = vector.load %arg3[%c0_4, %c0_5] : memref<8x256xf32, #tpu.memory_space<vmem>>, vector<8x256xf32>
    tpu.vector_store %arg3[%c0_4, %c0_5], %5 {strides = array<i32>} : memref<8x256xf32, #tpu.memory_space<vmem>>, vector<8x256xf32>,
    %c0_6 = arith.constant 0 : index
    %c0_7 = arith.constant 0 : index
    %7 = vector.load %arg4[%c0_6, %c0_7] : memref<8x1xf32, #tpu.memory_space<vmem>>, vector<8x1xf32>
    %cst_8 = arith.constant dense<0.000000e+00> : vector<8xf32>
    %8 = vector.multi_reduction <add>, %5, %cst_8 [1] : vector<8x256xf32> to vector<8xf32>
    %9 = vector.shape_cast %8 : vector<8xf32> to vector<8x1xf32>
    %10 = arith.addf %7, %9 : vector<8x1xf32>
    %c0_9 = arith.constant 0 : index
    %c0_10 = arith.constant 0 : index
    %11 = vector.load %arg4[%c0_9, %c0_10] : memref<8x1xf32, #tpu.memory_space<vmem>>, vector<8x1xf32>
    tpu.vector_store %arg4[%c0_9, %c0_10], %10 {strides = array<i32>} : memref<8x1xf32, #tpu.memory_space<vmem>>, vector<8x1xf32>,
    %c0_11 = arith.constant 0 : index
    %c0_12 = arith.constant 0 : index
    %12 = vector.load %arg5[%c0_11, %c0_12] : memref<8x1xf32, #tpu.memory_space<vmem>>, vector<8x1xf32>
    %13 = arith.mulf %5, %5 : vector<8x256xf32>
    %cst_13 = arith.constant dense<0.000000e+00> : vector<8xf32>
    %14 = vector.multi_reduction <add>, %13, %cst_13 [1] : vector<8x256xf32> to vector<8xf32>
    %15 = vector.shape_cast %14 : vector<8xf32> to vector<8x1xf32>
    %16 = arith.addf %12, %15 : vector<8x1xf32>
    %c0_14 = arith.constant 0 : index
    %c0_15 = arith.constant 0 : index
    %17 = vector.load %arg5[%c0_14, %c0_15] : memref<8x1xf32, #tpu.memory_space<vmem>>, vector<8x1xf32>
    tpu.vector_store %arg5[%c0_14, %c0_15], %16 {strides = array<i32>} : memref<8x1xf32, #tpu.memory_space<vmem>>, vector<8x1xf32>,
    return
  }
  func.func @transform_0(%arg0: i32) -> (i32, i32) {
    %c0_i32 = arith.constant 0 : i32
    %c0_i32_0 = arith.constant 0 : i32
    return %c0_i32, %arg0 : i32, i32
  }
  func.func @transform_1(%arg0: i32) -> (i32, i32) {
    %c0_i32 = arith.constant 0 : i32
    %c0_i32_0 = arith.constant 0 : i32
    %c0_i32_1 = arith.constant 0 : i32
    return %c0_i32, %c0_i32_0 : i32, i32
  }
  func.func @transform_2(%arg0: i32) -> (i32, i32) {
    %c0_i32 = arith.constant 0 : i32
    %c0_i32_0 = arith.constant 0 : i32
    return %c0_i32, %arg0 : i32, i32
  }
  func.func @transform_3(%arg0: i32) -> (i32, i32) {
    %c0_i32 = arith.constant 0 : i32
    %c0_i32_0 = arith.constant 0 : i32
    %c0_i32_1 = arith.constant 0 : i32
    return %c0_i32, %c0_i32_0 : i32, i32
  }
  func.func @transform_4(%arg0: i32) -> (i32, i32) {
    %c0_i32 = arith.constant 0 : i32
    %c0_i32_0 = arith.constant 0 : i32
    %c0_i32_1 = arith.constant 0 : i32
    return %c0_i32, %c0_i32_0 : i32, i32
  }
}

module attributes {stable_mosaic.version = 11 : i64} {
  func.func @_bn_mish_kernel(%arg0: i32, %arg1: memref<8x256xf32, #tpu.memory_space<vmem>>, %arg2: memref<8x1xf32, #tpu.memory_space<vmem>>, %arg3: memref<8x1xf32, #tpu.memory_space<vmem>>, %arg4: memref<8x256xf32, #tpu.memory_space<vmem>>) attributes {dimension_semantics = [#tpu.dimension_semantics<parallel>], iteration_bounds = array<i64: 2>, scalar_prefetch = 0 : i64, scratch_operands = 0 : i64, tpu.core_type = #tpu.core_type<tc>, window_params = [{transform_indices = @transform_0, window_bounds = array<i64: 8, 256>}, {pipeline_mode = #tpu.pipeline_mode<synchronous>, transform_indices = @transform_1, window_bounds = array<i64: 8, 1>}, {pipeline_mode = #tpu.pipeline_mode<synchronous>, transform_indices = @transform_2, window_bounds = array<i64: 8, 1>}, {transform_indices = @transform_3, window_bounds = array<i64: 8, 256>}]} {
    %c0 = arith.constant 0 : index
    %c0_0 = arith.constant 0 : index
    %0 = vector.load %arg1[%c0, %c0_0] : memref<8x256xf32, #tpu.memory_space<vmem>>, vector<8x256xf32>
    %c0_1 = arith.constant 0 : index
    %c0_2 = arith.constant 0 : index
    %1 = vector.load %arg2[%c0_1, %c0_2] : memref<8x1xf32, #tpu.memory_space<vmem>>, vector<8x1xf32>
    %2 = vector.broadcast %1 : vector<8x1xf32> to vector<8x256xf32>
    %3 = arith.mulf %0, %2 : vector<8x256xf32>
    %c0_3 = arith.constant 0 : index
    %c0_4 = arith.constant 0 : index
    %4 = vector.load %arg3[%c0_3, %c0_4] : memref<8x1xf32, #tpu.memory_space<vmem>>, vector<8x1xf32>
    %5 = vector.broadcast %4 : vector<8x1xf32> to vector<8x256xf32>
    %6 = arith.addf %3, %5 : vector<8x256xf32>
    %7 = math.absf %6 : vector<8x256xf32>
    %cst = arith.constant 0.000000e+00 : f32
    %8 = vector.broadcast %cst : f32 to vector<8x256xf32>
    %9 = arith.subf %8, %7 : vector<8x256xf32>
    %10 = math.exp %9 : vector<8x256xf32>
    %cst_5 = arith.constant 0.000000e+00 : f32
    %11 = vector.broadcast %cst_5 : f32 to vector<8x256xf32>
    %12 = arith.cmpf oge, %6, %11 : vector<8x256xf32>
    %cst_6 = arith.constant 2.000000e+00 : f32
    %13 = vector.broadcast %cst_6 : f32 to vector<8x256xf32>
    %14 = arith.mulf %13, %10 : vector<8x256xf32>
    %cst_7 = arith.constant 1.000000e+00 : f32
    %15 = vector.broadcast %cst_7 : f32 to vector<8x256xf32>
    %16 = arith.addf %15, %14 : vector<8x256xf32>
    %cst_8 = arith.constant 2.000000e+00 : f32
    %17 = vector.broadcast %cst_8 : f32 to vector<8x256xf32>
    %18 = arith.addf %10, %17 : vector<8x256xf32>
    %19 = arith.mulf %10, %18 : vector<8x256xf32>
    %20 = arith.select %12, %16, %19 : vector<8x256xi1>, vector<8x256xf32>
    %cst_9 = arith.constant 2.000000e+00 : f32
    %21 = vector.broadcast %cst_9 : f32 to vector<8x256xf32>
    %22 = arith.mulf %21, %10 : vector<8x256xf32>
    %cst_10 = arith.constant 1.000000e+00 : f32
    %23 = vector.broadcast %cst_10 : f32 to vector<8x256xf32>
    %24 = arith.addf %23, %22 : vector<8x256xf32>
    %cst_11 = arith.constant 2.000000e+00 : f32
    %25 = vector.broadcast %cst_11 : f32 to vector<8x256xf32>
    %26 = arith.mulf %25, %10 : vector<8x256xf32>
    %27 = arith.mulf %26, %10 : vector<8x256xf32>
    %28 = arith.addf %24, %27 : vector<8x256xf32>
    %cst_12 = arith.constant 2.000000e+00 : f32
    %29 = vector.broadcast %cst_12 : f32 to vector<8x256xf32>
    %30 = arith.addf %10, %29 : vector<8x256xf32>
    %31 = arith.mulf %10, %30 : vector<8x256xf32>
    %cst_13 = arith.constant 2.000000e+00 : f32
    %32 = vector.broadcast %cst_13 : f32 to vector<8x256xf32>
    %33 = arith.addf %31, %32 : vector<8x256xf32>
    %34 = arith.select %12, %28, %33 : vector<8x256xi1>, vector<8x256xf32>
    %35 = arith.mulf %6, %20 : vector<8x256xf32>
    %36 = tpu.reciprocal %34 {approx = true} : vector<8x256xf32> -> vector<8x256xf32>
    %37 = arith.mulf %35, %36 : vector<8x256xf32>
    %c0_14 = arith.constant 0 : index
    %c0_15 = arith.constant 0 : index
    %38 = vector.load %arg4[%c0_14, %c0_15] : memref<8x256xf32, #tpu.memory_space<vmem>>, vector<8x256xf32>
    tpu.vector_store %arg4[%c0_14, %c0_15], %37 {strides = array<i32>} : memref<8x256xf32, #tpu.memory_space<vmem>>, vector<8x256xf32>,
    return
  }
  func.func @transform_0(%arg0: i32) -> (i32, i32) {
    %c0_i32 = arith.constant 0 : i32
    %c0_i32_0 = arith.constant 0 : i32
    return %c0_i32, %arg0 : i32, i32
  }
  func.func @transform_1(%arg0: i32) -> (i32, i32) {
    %c0_i32 = arith.constant 0 : i32
    %c0_i32_0 = arith.constant 0 : i32
    %c0_i32_1 = arith.constant 0 : i32
    return %c0_i32, %c0_i32_0 : i32, i32
  }
  func.func @transform_2(%arg0: i32) -> (i32, i32) {
    %c0_i32 = arith.constant 0 : i32
    %c0_i32_0 = arith.constant 0 : i32
    %c0_i32_1 = arith.constant 0 : i32
    return %c0_i32, %c0_i32_0 : i32, i32
  }
  func.func @transform_3(%arg0: i32) -> (i32, i32) {
    %c0_i32 = arith.constant 0 : i32
    %c0_i32_0 = arith.constant 0 : i32
    return %c0_i32, %arg0 : i32, i32
  }
}

</mosaic_0001>

<bundles_post_ra>
// kernel: simple_conv_forward.2
= control target key start
LH: loop header
LB: loop body
LE: loop exit
PB: predicated region body
PF: predicated region fallthrough
CT: control target
= control target key end

     0   :  { %s539_s15 = smov 0   ;;  %s541_s16 = smov 0   ;;  %s614_s0 = inlined_call_operand.vmem [shape: bf16[48,512], index: 0, kind: input, shape index: {}]   ;;  %s615_s1 = inlined_call_operand.vmem [shape: bf16[8,48], index: 1, kind: input, shape index: {}]   ;;  %s616_s2 = inlined_call_operand.vmem [shape: f32[8,512], index: 2, kind: output, shape index: {0}]   ;;  %s617_s3 = inlined_call_operand.vmem [shape: f32[8,1], index: 3, kind: output, shape index: {1}]   ;;  %s618_s4 = inlined_call_operand.vmem [shape: f32[8,1], index: 4, kind: output, shape index: {2}]  }
   0x1   :  { %s543_s17 = smov 0  }
   0x2 LB: > { %s431_s18 = sadd.s32 4294967295, %s510_s17   ;;  %s556_s19 = sadd.s32 1, %s510_s17   ;;  %s510_s17 = sphi %s543_s17, %s621_s17   ;;  %s506_s16 = sphi %s541_s16, %s620_s16   ;;  %s502_s15 = sphi %s539_s15, %s619_s15  }
   0x3   : > { %s19_s20 = ssub.s32 %s510_s17, %s556_s19  ;;  %s22_s21 = sadd.s32 1, %s506_s16 }
   0x4   : > { %p20_p0 = scmp.eq.s32.totalorder %s19_s20, 0  ;;  %p29_p1 = scmp.ne.s32.totalorder %s506_s16, %s502_s15 }
   0x5   : > { %p30_p2 = scmp.eq.s32.totalorder %s510_s17, 0  ;;  %p434_p4 = scmp.ge.s32.totalorder %s510_s17, 2 }
   0x6   : > { %s565_s22 = scalar_select %p20_p0, %s506_s16, %s22_s21  }
   0x7   : > { %p31_p3 = por %p30_p2, %p29_p1  ;;  %147 = sbr.rel (%p434_p4) target bundleno = 21 (0x15), region = 20 }
   0xe   : > { %150 = sbr.rel (!%p31_p3) target bundleno = 21 (0x15), region = 24  ;;  %s152_s23 = sand.u32 (%p31_p3), 1, %s506_s16  }
   0xf   : > { %s450_s24 = sshll.u32 (%p31_p3), %s510_s17, 3  ;;  %s451_s25 = smul.u32 (%p31_p3), 48, %s152_s23 }
  0x10   : > { %s157_s28 = scalar_lea.vmem (%p31_p3), %s614_s0, %s450_s24 }
  0x11   : > { %v195_v0 = vld [vmem:[%s157_s28] sm:$0xff] (%p31_p3)  ;;  %v197_v1 = vld [vmem:[%s157_s28 + $0x10] sm:$0xff] (%p31_p3)  ;;  %s154_s29 = scalar_lea.vmem (%p31_p3), [#allocation2], %s451_s25 }
  0x12   : > { %v199_v2 = vld [vmem:[%s157_s28 + $0x20] sm:$0xff] (%p31_p3)  ;;  %v201_v3 = vld [vmem:[%s157_s28 + $0x30] sm:$0xff] (%p31_p3)  ;;  %196 = vst [vmem:[%s154_s29] sm:$0xff] (%p31_p3), %v195_v0  ;;  %198 = vst [vmem:[%s154_s29 + $0x8] sm:$0xff] (%p31_p3), %v197_v1 }
  0x13   : > { %v203_v4 = vld [vmem:[%s157_s28 + $0x40] sm:$0xff] (%p31_p3)  ;;  %v205_v5 = vld [vmem:[%s157_s28 + $0x50] sm:$0xff] (%p31_p3)  ;;  %200 = vst [vmem:[%s154_s29 + $0x10] sm:$0xff] (%p31_p3), %v199_v2  ;;  %202 = vst [vmem:[%s154_s29 + $0x18] sm:$0xff] (%p31_p3), %v201_v3 }
  0x14   : > { %204 = vst [vmem:[%s154_s29 + $0x20] sm:$0xff] (%p31_p3), %v203_v4  ;;  %206 = vst [vmem:[%s154_s29 + $0x28] sm:$0xff] (%p31_p3), %v205_v5 }
  0x15 PF: > { %p437_p5 = scmp.ge.s32.totalorder %s510_s17, 1  ;;  %p211_p6 = scmp.lt.s32.totalorder %s510_s17, 3 }
  0x17   : > { %p212_p7 = pnand %p437_p5, %p211_p6 }
  0x18   : > { %s218_s30 = sand.u32 (!%p212_p7), 1, %s502_s15   ;;  %s438_s5 = sshll.u32 (!%p212_p7), %s431_s18, 1 }
  0x19   : > { %215 = sbr.rel (%p212_p7) target bundleno = 416 (0x1a0), region = 62  ;;  %p245_p8 = scmp.lt.s32.totalorder (!%p212_p7), %s438_s5, 3 }
  0x1a   : > { %s452_s6 = smul.u32 (!%p212_p7), 48, %s218_s30  ;;  %p440_p9 = scmp.ne.s32.totalorder (!%p212_p7), %s431_s18, 0 }
  0x1c   : > { %s220_s11 = scalar_lea.vmem (!%p212_p7), [#allocation2], %s452_s6 }
  0x20   : > { %s623_s5 = smov (!%p245_p8, %s438_s5), 3  ;;  %254 = sbr.rel (%p440_p9) target bundleno = 39 (0x27), region = 70 }
  0x21   : > { %s439_s7 = sshll.u32 %s623_s5, 3  ;;  %vm255_vm0 = vcmask (!%p440_p9), 7168   ;;  %v512_v6 = vmov (!%p440_p9), 0.0  }
  0x22   : > { %s248_s10 = scalar_lea.vmem %s616_s2, %s439_s7  ;;  %256 = vst.msk [vmem:[%s617_s3] sm:$0xff] (!%p440_p9), %vm255_vm0, %v512_v6  ;;  %257 = vst.msk [vmem:[%s618_s4] sm:$0xff] (!%p440_p9), %vm255_vm0, %v512_v6 }
  0x27 PF: > { %v479_v7 = vld [vmem:[%s220_s11 + $0x4] ss:$8 sps:$4 sm:$0xff]   ;;  %v481_v8 = vld [vmem:[%s220_s11] ss:$8 sps:$4 sm:$0xff]   ;;  %v513_v9 = vmov 0   ;;  %vm295_vm1 = vcmask 392192  }
  0x28   : > { %331 = vmatprep.mubr.bf16.mxu0 %v513_v9  ;;  %299 = vmatprep.subr.bf16.mxu0 %v479_v7  ;;  %v482_v10 = vld [vmem:[%s220_s11 + $0x14] ss:$8 sps:$4 sm:$0xff]   ;;  %v484_v11 = vld [vmem:[%s220_s11 + $0x10] ss:$8 sps:$4 sm:$0xff]   ;;  %v485_v12 = vld [vmem:[%s220_s11 + $0x24] ss:$8 sps:$4 sm:$0xff]  }
  0x29   : > { %300 = vmatpush1.bf16.msra.mxu0 %v481_v8  ;;  %v487_v13 = vld [vmem:[%s220_s11 + $0x20] ss:$8 sps:$4 sm:$0xff]   ;;  %vm347_vm2 = vcmask 7168  }
  0x2a   : > { %301 = vmatprep.subr.bf16.mxu0 %v482_v10  ;;  %v258_v14 = vld [vmem:[%s615_s1] sm:$0xf] }
  0x2b   : > { %v342_v23 = vld [vmem:[%s617_s3] sm:$0xff] }
  0x2c   : > { %v349_v26 = vld [vmem:[%s618_s4] sm:$0xff] }
  0x2d   : > { %302 = vmatpush1.bf16.msra.mxu0 %v484_v11 }
  0x2e   : > { %303 = vmatprep.subr.bf16.mxu0 %v485_v12 }
  0x31   : > { %304 = vmatpush1.bf16.msra.mxu0 %v487_v13 }
  0x34   : > { %447 = vmatmul.mubr.msk.bf16.vlgmr.msra.gmra.mrb[0].mxu0 %vm295_vm1, %v258_v14 }
 0x107   : > { %v333_v15 = vpop.f32.mrb[0].mxu0 }
 0x108   : > { %340 = vst [vmem:[%s248_s10] sm:$0xff] %v333_v15  ;;  %v335_v16 = vpop.f32.mrb[1].mxu0  ;;  %v350_v17 = vmul.f32 %v333_v15, %v333_v15 }
 0x109   : > { %341 = vst [vmem:[%s248_s10 + $0x8] sm:$0xff] %v335_v16  ;;  %v337_v18 = vpop.f32.mrb[2].mxu0  ;;  %v343_v19 = vadd.f32 %v335_v16, %v333_v15  ;;  %v351_v20 = vmul.f32 %v335_v16, %v335_v16 }
 0x10a   : > { %v338_v21 = vpop.f32.mrb[3].mxu0 }
 0x10b   : > { %344 = vadd.xlane.f32.xlu0 %v343_v19  ;;  %v352_v22 = vadd.f32 %v351_v20, %v350_v17 }
 0x10f   : > { %353 = vadd.xlane.f32.xlu0 %v352_v22 }
 0x198   : > { %v345_v24 = vpop.xlane.xlu0 %344 }
 0x199   : > { %v346_v25 = vadd.f32 %v345_v24, %v342_v23 }
 0x19b   : > { %348 = vst.msk [vmem:[%s617_s3] sm:$0xff] %vm347_vm2, %v346_v25 }
 0x19c   : > { %v354_v27 = vpop.xlane.xlu0 %353 }
 0x19d   : > { %v355_v28 = vadd.f32 %v354_v27, %v349_v26 }
 0x19f   : > { %356 = vst.msk [vmem:[%s618_s4] sm:$0xff] %vm347_vm2, %v355_v28 }
 0x1a0 PF: > { %p12_p10 = scmp.ge.s32.totalorder %s556_s19, 4   ;;  %s619_s15 = smov %s506_s16 }
 0x1a1   : > { %s620_s16 = smov %s565_s22  ;;  %s621_s17 = smov %s556_s19 }
 0x1a2   :  { %14 = sbr.rel (!%p12_p10) target bundleno = 2 (0x2), region = 121 }

// kernel: simple_conv_forward.3
= control target key start
LH: loop header
LB: loop body
LE: loop exit
PB: predicated region body
PF: predicated region fallthrough
CT: control target
= control target key end

     0   :  { %s342_s12 = smov 0   ;;  %s372_s0 = inlined_call_operand.vmem [shape: f32[8,512], index: 0, kind: input, shape index: {}]   ;;  %s373_s1 = inlined_call_operand.vmem [shape: f32[8,1], index: 1, kind: input, shape index: {}]   ;;  %s374_s2 = inlined_call_operand.vmem [shape: f32[8,1], index: 2, kind: input, shape index: {}]   ;;  %s375_s3 = inlined_call_operand.vmem [shape: f32[8,512], index: 3, kind: output, shape index: {}]  }
   0x1 LB: > { %s284_s13 = sadd.s32 4294967295, %s319_s12   ;;  %p288_p0 = scmp.ge.s32.totalorder %s319_s12, 1  ;;  %s319_s12 = sphi %s342_s12, %s13_s12  }
   0x2   : > { %p138_p1 = scmp.lt.s32.totalorder %s319_s12, 3 }
   0x4   : > { %p139_p2 = pnand %p288_p0, %p138_p1 }
   0x5   : > { %v176_v0 = vld [vmem:[%s373_s1] sm:$0xff] (!%p139_p2)  ;;  %v321_v1 = vmov (!%p139_p2), 0   ;;  %s289_s18 = sshll.u32 (!%p139_p2), %s284_s13, 1 }
   0x6   : > { %142 = sbr.rel (%p139_p2) target bundleno = 180 (0xb4), region = 32  ;;  %304 = vset.pattern.permute.xlu0 (!%p139_p2), %v321_v1  ;;  %v184_v2 = vld [vmem:[%s374_s2] sm:$0xff] (!%p139_p2)  ;;  %p163_p3 = scmp.lt.s32.totalorder (!%p139_p2), %s289_s18, 3 }
   0x7   : > { %179 = vperm.xlu0 (!%p139_p2), %304, %v176_v0  }
   0xb   : > { %187 = vperm.xlu0 (!%p139_p2), %304, %v184_v2  }
   0xd   : > { %s377_s18 = smov (!%p163_p3, %s289_s18), 3 }
   0xe   : > { %s290_s19 = sshll.u32 %s377_s18, 3 }
   0xf   : > { %s166_s22 = scalar_lea.vmem %s372_s0, %s290_s19  ;;  %s172_s25 = scalar_lea.vmem %s375_s3, %s290_s19 }
  0x10   : > { %v174_v4 = vld [vmem:[%s166_s22] sm:$0xff]  ;;  %v175_v5 = vld [vmem:[%s166_s22 + $0x8] sm:$0xff] }
  0x86   : > { %v180_v3 = vpop.permute.xlu0 %179 }
  0x87   : > { %v182_v6 = vmul.f32 %v180_v3, %v174_v4  ;;  %v183_v7 = vmul.f32 %v180_v3, %v175_v5 }
  0x8a   : > { %v188_v8 = vpop.permute.xlu0 %187 }
  0x8b   : > { %v190_v9 = vadd.f32 %v188_v8, %v182_v6  ;;  %v191_v10 = vadd.f32 %v188_v8, %v183_v7 }
  0x8d   : > { %v192_v11 = vand.u32 2147483647, %v190_v9  ;;  %v193_v12 = vand.u32 2147483647, %v191_v10  ;;  %vm200_vm0 = vcmp.ge.f32.partialorder %v190_v9, 0.0  ;;  %vm201_vm1 = vcmp.ge.f32.partialorder %v191_v10, 0.0 }
  0x8f   : > { %v194_v13 = vsub.f32 0.0, %v192_v11  ;;  %v195_v14 = vsub.f32 0.0, %v193_v12 }
  0x91   : > { %v196_v15 = vmul.f32 1.442695, %v194_v13  ;;  %v198_v16 = vmul.f32 1.442695, %v195_v14 }
  0x93   : > { %305 = vpow2.f32 %v196_v15 }
  0x94   : > { %307 = vpow2.f32 %v198_v16 }
  0x9d   : > { %v306_v17 = vpop.eup %305 }
  0x9e   : > { %v308_v18 = vpop.eup %307  ;;  %v202_v19 = vmul.f32 2.0, %v306_v17  ;;  %v206_v20 = vadd.f32 2.0, %v306_v17 }
  0x9f   : > { %v203_v21 = vmul.f32 2.0, %v308_v18  ;;  %v207_v22 = vadd.f32 2.0, %v308_v18 }
  0xa0   : > { %v204_v23 = vadd.f32 1.0, %v202_v19  ;;  %v208_v24 = vmul.f32 %v306_v17, %v206_v20  ;;  %v212_v25 = vmul.f32 %v306_v17, %v202_v19 }
  0xa1   : > { %v205_v26 = vadd.f32 1.0, %v203_v21  ;;  %v209_v27 = vmul.f32 %v308_v18, %v207_v22  ;;  %v213_v28 = vmul.f32 %v308_v18, %v203_v21 }
  0xa2   : > { %v214_v29 = vadd.f32 %v212_v25, %v204_v23  ;;  %v216_v30 = vadd.f32 2.0, %v208_v24  ;;  %v210_v35 = vsel %vm200_vm0, %v204_v23, %v208_v24 }
  0xa3   : > { %v215_v31 = vadd.f32 %v213_v28, %v205_v26  ;;  %v217_v32 = vadd.f32 2.0, %v209_v27  ;;  %v211_v36 = vsel %vm201_vm1, %v205_v26, %v209_v27  ;;  %v220_v37 = vmul.f32 %v210_v35, %v190_v9 }
  0xa4   : > { %v218_v33 = vsel %vm200_vm0, %v214_v29, %v216_v30  ;;  %v221_v39 = vmul.f32 %v211_v36, %v191_v10 }
  0xa5   : > { %v219_v34 = vsel %vm201_vm1, %v215_v31, %v217_v32  ;;  %309 = vrcp.f32 %v218_v33 }
  0xa6   : > { %311 = vrcp.f32 %v219_v34 }
  0xaf   : > { %v310_v38 = vpop.eup %309 }
  0xb0   : > { %v312_v40 = vpop.eup %311  ;;  %v224_v41 = vmul.f32 %v310_v38, %v220_v37 }
  0xb1   : > { %v225_v42 = vmul.f32 %v312_v40, %v221_v39 }
  0xb2   : > { %226 = vst [vmem:[%s172_s25] sm:$0xff] %v224_v41 }
  0xb3   : > { %227 = vst [vmem:[%s172_s25 + $0x8] sm:$0xff] %v225_v42 }
  0xb4 PF: > { %s13_s12 = sadd.s32 1, %s319_s12  }
  0xb5   : > { %p10_p4 = scmp.ge.s32.totalorder %s13_s12, 4  }
  0xb7   :  { %12 = sbr.rel (!%p10_p4) target bundleno = 1 (0x1), region = 62 }

</bundles_post_ra>
